<compile_context>
chip_gen: v7x
topology: tpu7x:2x2x1
jax: 0.10.0
libtpu: 0.0.40
codegen_flags: <defaults>
</compile_context>

<pallas_src>
import jax
import jax.numpy as jnp
from jax.experimental import pallas as pl
from jax.experimental.pallas import tpu as pltpu

_LANE = 128
_SUBLANE = 8


def _round_up(n, m):
    return ((n + m - 1) // m) * m


def los_predictor_kernel(x_ref, wc_ref, bc_ref, w_ref, b_ref, o_ref):
    # x_ref: (TB, Kp)   wc_ref: (Kp, Hp)   bc_ref: (1, Hp)
    # w_ref: (Hp, Lp)   b_ref:  (1, Lp)    o_ref:  (TB, Lp)
    #
    # ---- synthetic core_model: (mean-pool folded into wc_ref) + tanh -------
    h = jnp.tanh(
        jnp.dot(x_ref[...], wc_ref[...], preferred_element_type=jnp.float32)
        + bc_ref[...].astype(jnp.float32)
    )                                                                # (TB, Hp)

    # ---- LOS head: Linear -> Dropout(eval=identity) -> Softmax -------------
    # Padded label lanes carry bias -1e30 -> exp() == 0, so the softmax over
    # the lane-padded width equals the softmax over label_dim.
    logits = (
        jnp.dot(h.astype(w_ref.dtype), w_ref[...],
                preferred_element_type=jnp.float32)
        + b_ref[...].astype(jnp.float32)
    )                                                                # (TB, Lp)
    m = jnp.max(logits, axis=-1, keepdims=True)
    e = jnp.exp(logits - m)
    denom = jnp.sum(e, axis=-1, keepdims=True)
    probs = e * pl.reciprocal(denom, approx=True)                    # EUP slot
    o_ref[...] = probs.astype(o_ref.dtype)


def los_predictor(x, w_core, b_core, w_lin, b_lin, *, block_b=512,
                  compute_dtype=jnp.float32):
    B, T, D_in = x.shape
    H = w_core.shape[1]
    L = w_lin.shape[1]

    # ---- fold mean-pool into the weight; make x a lane-dense 2-D operand ---
    K = T * D_in
    Kp = _round_up(max(K, _LANE), _LANE)
    Hp = _round_up(max(H, _LANE), _LANE)
    Lp = _round_up(max(L, _LANE), _LANE)

    x2d = x.reshape(B, K)
    wc_fold = jnp.tile(w_core, (T, 1)) * (1.0 / T)                   # (K, H)
    wc_pad = jnp.pad(wc_fold, ((0, Kp - K), (0, Hp - H)))            # zeros
    bc_pad = jnp.pad(b_core.reshape(1, H).astype(jnp.float32),
                     ((0, 0), (0, Hp - H)))                          # zeros

    w_pad = jnp.pad(w_lin, ((0, Hp - H), (0, Lp - L)))               # zeros
    b_row = b_lin.reshape(1, L).astype(jnp.float32)
    if Lp > L:
        b_pad = jnp.concatenate(
            [b_row, jnp.full((1, Lp - L), -1e30, dtype=jnp.float32)], axis=1)
    else:
        b_pad = b_row

    # Optional bf16 operand path (v6e/v7x): halves the dominant x stream.
    x2d = x2d.astype(compute_dtype)
    wc_pad = wc_pad.astype(compute_dtype)
    w_pad = w_pad.astype(compute_dtype)

    # ---- batch tiling: pick TB from B, keep >= 2 (even) tiles when useful --
    B_sub = _round_up(B, _SUBLANE)
    n_tiles = pl.cdiv(B_sub, block_b)
    if n_tiles == 1 and B_sub >= 2 * _SUBLANE:
        n_tiles = 2          # give v7x megacore two tiles; cheap on v5e/v6e
    if n_tiles > 1 and n_tiles % 2 == 1:
        n_tiles += 1         # balanced split across two TensorCores
    TB = _round_up(pl.cdiv(B_sub, n_tiles), _SUBLANE)
    B_pad = TB * n_tiles
    if Kp > K or B_pad > B:
        x2d = jnp.pad(x2d, ((0, B_pad - B), (0, Kp - K)))
    grid = (n_tiles,)

    # ---- VMEM budget (lane/sublane padded, real itemsizes) -----------------
    x_itemsize = jnp.dtype(x2d.dtype).itemsize
    w_itemsize = jnp.dtype(wc_pad.dtype).itemsize
    x_tile_bytes = TB * Kp * x_itemsize
    out_tile_bytes = TB * Lp * 4
    w_bytes = (Kp * Hp * w_itemsize + _SUBLANE * Hp * 4
               + Hp * Lp * w_itemsize + _SUBLANE * Lp * 4)
    vmem_need = 2 * (x_tile_bytes + out_tile_bytes) + 2 * w_bytes + (4 << 20)
    try:
        phys = int(getattr(pltpu.get_tpu_info(), "vmem_capacity_bytes",
                           64 << 20))
    except Exception:
        phys = 64 << 20
    vmem_cap = max(32 << 20, (phys * 3) // 4)    # 48 MiB on v7x, 96 on v5e/v6e
    vmem_bytes = min(max(vmem_need, 16 << 20), vmem_cap)

    cost = pl.CostEstimate(
        flops=2 * B_pad * Kp * Hp + 2 * B_pad * Hp * Lp,
        transcendentals=B_pad * (Hp + Lp + 1),
        bytes_accessed=B_pad * Kp * x_itemsize + w_bytes + B_pad * Lp * 4,
    )

    out = pl.pallas_call(
        los_predictor_kernel,
        out_shape=jax.ShapeDtypeStruct((B_pad, Lp), jnp.float32),
        grid_spec=pltpu.PrefetchScalarGridSpec(
            num_scalar_prefetch=0,
            grid=grid,
            in_specs=[
                pl.BlockSpec((TB, Kp), lambda i: (i, 0)),    # streamed
                pl.BlockSpec((Kp, Hp), lambda i: (0, 0)),    # resident
                pl.BlockSpec((1, Hp), lambda i: (0, 0)),     # resident
                pl.BlockSpec((Hp, Lp), lambda i: (0, 0)),    # resident
                pl.BlockSpec((1, Lp), lambda i: (0, 0)),     # resident
            ],
            out_specs=pl.BlockSpec((TB, Lp), lambda i: (i, 0)),
        ),
        compiler_params=pltpu.CompilerParams(
            dimension_semantics=("parallel",),
            vmem_limit_bytes=int(vmem_bytes),
        ),
        cost_estimate=cost,
    )(x2d, wc_pad, bc_pad, w_pad, b_pad)

    return out[:B, :L]


def los_predictor_ref(x, w_core, b_core, w_lin, b_lin):
    pooled = jnp.mean(x.astype(jnp.float32), axis=1)
    h = jnp.tanh(pooled @ w_core + b_core.reshape(1, -1))
    logits = h @ w_lin + b_lin.reshape(1, -1)
    return jax.nn.softmax(logits, axis=-1)


if __name__ == "__main__":
    # Small shapes consistent with the module's forward:
    #   batch=2, seq=8, input features=16, hidden (core output_dim)=32, label_dim=8
    B, T, D_IN, H, L = 2, 8, 16, 32, 8

    key = jax.random.PRNGKey(0)
    kx, kwc, kbc, kw, kb, kx2 = jax.random.split(key, 6)

    x = jax.random.normal(kx, (B, T, D_IN), dtype=jnp.float32)

    # Deterministic parameter init (synthetic, no checkpoint loading).
    w_core = jax.random.normal(kwc, (D_IN, H), dtype=jnp.float32) * 0.1
    b_core = jax.random.normal(kbc, (1, H), dtype=jnp.float32) * 0.1
    w_lin = jax.random.normal(kw, (H, L), dtype=jnp.float32) * 0.1
    b_lin = jax.random.normal(kb, (1, L), dtype=jnp.float32) * 0.1

    out = jax.block_until_ready(los_predictor(x, w_core, b_core, w_lin, b_lin))
    ref = los_predictor_ref(x, w_core, b_core, w_lin, b_lin)
    assert out.shape == (B, L)
    # approx=True reciprocal -> relax tolerance slightly vs. exact softmax.
    assert jnp.allclose(out, ref, atol=2e-3, rtol=2e-3), "mismatch vs JAX reference"
    assert jnp.allclose(jnp.sum(out, axis=-1), 1.0, atol=2e-3), "softmax rows must sum to ~1"

    # Larger batch: exercises the multi-tile grid path (TB=136, grid=2, only
    # 12 padded rows) and the partial final-tile handling.
    B2 = 260
    x2 = jax.random.normal(kx2, (B2, T, D_IN), dtype=jnp.float32)
    out2 = jax.block_until_ready(los_predictor(x2, w_core, b_core, w_lin, b_lin))
    ref2 = los_predictor_ref(x2, w_core, b_core, w_lin, b_lin)
    assert out2.shape == (B2, L)
    assert jnp.allclose(out2, ref2, atol=2e-3, rtol=2e-3), "mismatch vs JAX reference (batched)"

    print("KERNEL_OK")
</pallas_src>

<mosaic_0001>
module attributes {stable_mosaic.version = 11 : i64} {
  func.func @los_predictor_kernel(%arg0: i32, %arg1: memref<8x128xf32, #tpu.memory_space<vmem>>, %arg2: memref<128x128xf32, #tpu.memory_space<vmem>>, %arg3: memref<1x128xf32, #tpu.memory_space<vmem>>, %arg4: memref<128x128xf32, #tpu.memory_space<vmem>>, %arg5: memref<1x128xf32, #tpu.memory_space<vmem>>, %arg6: memref<8x128xf32, #tpu.memory_space<vmem>>) attributes {dimension_semantics = [#tpu.dimension_semantics<parallel>], iteration_bounds = array<i64: 1>, scalar_prefetch = 0 : i64, scratch_operands = 0 : i64, tpu.core_type = #tpu.core_type<tc>, window_params = [{transform_indices = @transform_0, window_bounds = array<i64: 8, 128>}, {pipeline_mode = #tpu.pipeline_mode<synchronous>, transform_indices = @transform_1, window_bounds = array<i64: 128, 128>}, {pipeline_mode = #tpu.pipeline_mode<synchronous>, transform_indices = @transform_2, window_bounds = array<i64: 1, 128>}, {pipeline_mode = #tpu.pipeline_mode<synchronous>, transform_indices = @transform_3, window_bounds = array<i64: 128, 128>}, {pipeline_mode = #tpu.pipeline_mode<synchronous>, transform_indices = @transform_4, window_bounds = array<i64: 1, 128>}, {transform_indices = @transform_5, window_bounds = array<i64: 8, 128>}]} {
    %c0 = arith.constant 0 : index
    %c0_0 = arith.constant 0 : index
    %0 = vector.load %arg1[%c0, %c0_0] : memref<8x128xf32, #tpu.memory_space<vmem>>, vector<8x128xf32>
    %c0_1 = arith.constant 0 : index
    %c0_2 = arith.constant 0 : index
    %1 = vector.load %arg2[%c0_1, %c0_2] : memref<128x128xf32, #tpu.memory_space<vmem>>, vector<128x128xf32>
    %cst = arith.constant dense<0.000000e+00> : vector<8x128xf32>
    %2 = tpu.matmul %0, %1, %cst {dimension_numbers = #tpu.dot_dimension_numbers<[1], [0], [0], [1], [0, 0, 1, 1], [], []>} : vector<8x128xf32>, vector<128x128xf32>, vector<8x128xf32> -> vector<8x128xf32>
    %c0_3 = arith.constant 0 : index
    %c0_4 = arith.constant 0 : index
    %3 = vector.load %arg3[%c0_3, %c0_4] : memref<1x128xf32, #tpu.memory_space<vmem>>, vector<1x128xf32>
    %4 = vector.broadcast %3 : vector<1x128xf32> to vector<8x128xf32>
    %5 = arith.addf %2, %4 : vector<8x128xf32>
    %6 = math.tanh %5 : vector<8x128xf32>
    %c0_5 = arith.constant 0 : index
    %c0_6 = arith.constant 0 : index
    %7 = vector.load %arg4[%c0_5, %c0_6] : memref<128x128xf32, #tpu.memory_space<vmem>>, vector<128x128xf32>
    %cst_7 = arith.constant dense<0.000000e+00> : vector<8x128xf32>
    %8 = tpu.matmul %6, %7, %cst_7 {dimension_numbers = #tpu.dot_dimension_numbers<[1], [0], [0], [1], [0, 0, 1, 1], [], []>} : vector<8x128xf32>, vector<128x128xf32>, vector<8x128xf32> -> vector<8x128xf32>
    %c0_8 = arith.constant 0 : index
    %c0_9 = arith.constant 0 : index
    %9 = vector.load %arg5[%c0_8, %c0_9] : memref<1x128xf32, #tpu.memory_space<vmem>>, vector<1x128xf32>
    %10 = vector.broadcast %9 : vector<1x128xf32> to vector<8x128xf32>
    %11 = arith.addf %8, %10 : vector<8x128xf32>
    %cst_10 = arith.constant dense<0xFF800000> : vector<8xf32>
    %12 = vector.multi_reduction <maximumf>, %11, %cst_10 [1] : vector<8x128xf32> to vector<8xf32>
    %13 = vector.shape_cast %12 : vector<8xf32> to vector<8x1xf32>
    %14 = vector.broadcast %13 : vector<8x1xf32> to vector<8x128xf32>
    %15 = arith.subf %11, %14 : vector<8x128xf32>
    %16 = math.exp %15 : vector<8x128xf32>
    %cst_11 = arith.constant dense<0.000000e+00> : vector<8xf32>
    %17 = vector.multi_reduction <add>, %16, %cst_11 [1] : vector<8x128xf32> to vector<8xf32>
    %18 = vector.shape_cast %17 : vector<8xf32> to vector<8x1xf32>
    %19 = tpu.reciprocal %18 {approx = true} : vector<8x1xf32> -> vector<8x1xf32>
    %20 = vector.broadcast %19 : vector<8x1xf32> to vector<8x128xf32>
    %21 = arith.mulf %16, %20 : vector<8x128xf32>
    %c0_12 = arith.constant 0 : index
    %c0_13 = arith.constant 0 : index
    %22 = vector.load %arg6[%c0_12, %c0_13] : memref<8x128xf32, #tpu.memory_space<vmem>>, vector<8x128xf32>
    tpu.vector_store %arg6[%c0_12, %c0_13], %21 {strides = array<i32>} : memref<8x128xf32, #tpu.memory_space<vmem>>, vector<8x128xf32>,
    return
  }
  func.func @transform_0(%arg0: i32) -> (i32, i32) {
    %c0_i32 = arith.constant 0 : i32
    %c0_i32_0 = arith.constant 0 : i32
    return %arg0, %c0_i32 : i32, i32
  }
  func.func @transform_1(%arg0: i32) -> (i32, i32) {
    %c0_i32 = arith.constant 0 : i32
    %c0_i32_0 = arith.constant 0 : i32
    %c0_i32_1 = arith.constant 0 : i32
    return %c0_i32, %c0_i32_0 : i32, i32
  }
  func.func @transform_2(%arg0: i32) -> (i32, i32) {
    %c0_i32 = arith.constant 0 : i32
    %c0_i32_0 = arith.constant 0 : i32
    %c0_i32_1 = arith.constant 0 : i32
    return %c0_i32, %c0_i32_0 : i32, i32
  }
  func.func @transform_3(%arg0: i32) -> (i32, i32) {
    %c0_i32 = arith.constant 0 : i32
    %c0_i32_0 = arith.constant 0 : i32
    %c0_i32_1 = arith.constant 0 : i32
    return %c0_i32, %c0_i32_0 : i32, i32
  }
  func.func @transform_4(%arg0: i32) -> (i32, i32) {
    %c0_i32 = arith.constant 0 : i32
    %c0_i32_0 = arith.constant 0 : i32
    %c0_i32_1 = arith.constant 0 : i32
    return %c0_i32, %c0_i32_0 : i32, i32
  }
  func.func @transform_5(%arg0: i32) -> (i32, i32) {
    %c0_i32 = arith.constant 0 : i32
    %c0_i32_0 = arith.constant 0 : i32
    return %arg0, %c0_i32 : i32, i32
  }
}

</mosaic_0001>

<bundles_post_ra>
// kernel: tpu_custom_call.1
= control target key start
LH: loop header
LB: loop body
LE: loop exit
PB: predicated region body
PF: predicated region fallthrough
CT: control target
= control target key end

     0   :  { %10 = vsyncpa [#allocation3], 0  ;;  %s652_s0 = inlined_call_operand.hbm [shape: f32[8,128], index: 0, kind: input, shape index: {}]   ;;  %s653_s1 = inlined_call_operand.hbm [shape: f32[128,128], index: 1, kind: input, shape index: {}]   ;;  %s654_s2 = inlined_call_operand.vmem [shape: f32[1,128], index: 2, kind: input, shape index: {}]   ;;  %s655_s3 = inlined_call_operand.hbm [shape: f32[128,128], index: 3, kind: input, shape index: {}]   ;;  %s656_s4 = inlined_call_operand.vmem [shape: f32[1,128], index: 4, kind: input, shape index: {}]   ;;  %s657_s5 = inlined_call_operand.hbm [shape: f32[8,128], index: 5, kind: output, shape index: {}]  }
   0x1   :  { %11 = vsyncpa [#allocation6], 0 }
   0x2   :  { %12 = vsyncpa [#allocation4], 0  ;;  %s537_s18 = smov [#allocation5]   ;;  %s443_s22 = scalar_lea.hbm %s653_s1, 2048 }
   0x3   :  { %s28_s19 = sshll.u32 %s537_s18, 4  ;;  %p444_p0 = scmp.ne.s32.totalorder %s653_s1, %s443_s22  ;;  %s29_s19 = int_to_ptr.vmem [resolvable:$true] %s28_s19 }
   0x4   :  { %p447_p1 = scmp.lt.u32.totalorder %s443_s22, %s653_s1 }
   0x6   :  { %p449_p2 = pnand %p447_p1, %p444_p0 }
   0x8   :  { %452 = shalt.err (!%p449_p2)
}
   0x9   :  { %s453_s27 = scalar_lea.vmem %s29_s19, 2048  ;;  %p458_p4 = scmp.lt.s32.totalorder %s29_s19, %s29_s19 }
   0xa   :  { %p454_p3 = scmp.ne.s32.totalorder %s29_s19, %s453_s27  ;;  %p459_p5 = scmp.lt.s32.totalorder %s453_s27, %s453_s27 }
   0xc   :  { %p460_p6 = por %p459_p5, %p458_p4 }
   0xe   :  { %p461_p7 = pnand %p460_p6, %p454_p3 }
  0x10   :  { %464 = shalt.err (!%p461_p7)
}
  0x11   :  { %s538_s28 = smov 128   ;;  %s539_s29 = smov 8  }
  0x12   :  { %34 = dma.hbm_to_vmem [thread:$0]  %s653_s1, 2048, %s29_s19, [#allocation6], %s538_s28, %s538_s28, %s539_s29  }
  0x13   :  { %s540_s7 = smov [#allocation2]   ;;  %s541_s9 = smov [#allocation7]  }
  0x14   :  { %s19_s8 = sshll.u32 %s540_s7, 4  ;;  %s42_s10 = sshll.u32 %s541_s9, 4  ;;  %s20_s8 = int_to_ptr.vmem [resolvable:$true] %s19_s8  ;;  %s43_s10 = int_to_ptr.vmem [resolvable:$true] %s42_s10 }
  0x15   :  { %s465_s13 = scalar_lea.hbm %s652_s0, 128 }
  0x16   :  { %p466_p8 = scmp.ne.s32.totalorder %s652_s0, %s465_s13  ;;  %p469_p9 = scmp.lt.u32.totalorder %s465_s13, %s652_s0 }
  0x18   :  { %p471_p10 = pnand %p469_p9, %p466_p8 }
  0x1a   :  { %474 = shalt.err (!%p471_p10)
}
  0x1b   :  { %s475_s1 = scalar_lea.vmem %s20_s8, 128  ;;  %p480_p12 = scmp.lt.s32.totalorder %s20_s8, %s20_s8 }
  0x1c   :  { %p476_p11 = scmp.ne.s32.totalorder %s20_s8, %s475_s1  ;;  %p481_p13 = scmp.lt.s32.totalorder %s475_s1, %s475_s1 }
  0x1e   :  { %p482_p0 = por %p481_p13, %p480_p12 }
  0x20   :  { %p483_p1 = pnand %p482_p0, %p476_p11 }
  0x22   :  { %486 = shalt.err (!%p483_p1)
}
  0x23   :  { %22 = dma.hbm_to_vmem [thread:$0]  %s652_s0, 128, %s20_s8, [#allocation3]  }
  0x24   :  { %s487_s22 = scalar_lea.hbm %s655_s3, 2048 }
  0x25   :  { %p488_p2 = scmp.ne.s32.totalorder %s655_s3, %s487_s22  ;;  %p491_p3 = scmp.lt.u32.totalorder %s487_s22, %s655_s3 }
  0x27   :  { %p493_p4 = pnand %p491_p3, %p488_p2 }
  0x29   :  { %496 = shalt.err (!%p493_p4)
}
  0x2a   :  { %s497_s27 = scalar_lea.vmem %s43_s10, 2048  ;;  %p502_p6 = scmp.lt.s32.totalorder %s43_s10, %s43_s10 }
  0x2b   :  { %p498_p5 = scmp.ne.s32.totalorder %s43_s10, %s497_s27  ;;  %p503_p7 = scmp.lt.s32.totalorder %s497_s27, %s497_s27 }
  0x2d   :  { %p504_p8 = por %p503_p7, %p502_p6 }
  0x2f   :  { %p505_p9 = pnand %p504_p8, %p498_p5 }
  0x31   :  { %508 = shalt.err (!%p505_p9)
}
  0x32   :  { %48 = dma.hbm_to_vmem [thread:$0]  %s655_s3, 2048, %s43_s10, [#allocation6], %s538_s28, %s538_s28, %s539_s29  }
  0x33   :  { %531 = dma.done.wait [#allocation3], 128  }
  0x34   :  { %532 = vsyncadd [#allocation3], 4294967168 }
  0x35   :  { %533 = dma.done.wait [#allocation6], 4096  }
  0x36   :  { %534 = vsyncadd [#allocation6], 4294963200  ;;  %v542_v0 = vmov 0.0|0.0   ;;  %vm543_vm0 = vmmov 0   ;;  %v544_v1 = vmov 0.0   ;;  %v61_v2 = vld [vmem:[#allocation5] sm:$0xff] }
  0x37   :  { %380 = vmatprep.subr.bf16.mxu0 %v542_v0  ;;  %342 = vmatprep.mubr.msk.f32.mxu0 %vm543_vm0, %v544_v1  ;;  %v62_v3 = vld [vmem:[#allocation5 + $0x8] sm:$0xff]  ;;  %v63_v4 = vld [vmem:[#allocation5 + $0x10] sm:$0xff]  ;;  %v64_v6 = vld [vmem:[#allocation5 + $0x18] sm:$0xff] }
  0x38   :  { %404 = vmatprep.subr.bf16.mxu1 %v542_v0  ;;  %377 = vmatprep.mubr.msk.f32.mxu1 %vm543_vm0, %v544_v1  ;;  %v381_v5 = vpack.c.bf16 %v62_v3, %v61_v2  ;;  %v384_v7 = vpack.c.bf16 %v64_v6, %v63_v4  ;;  %v65_v8 = vld [vmem:[#allocation5 + $0x20] sm:$0xff]  ;;  %v66_v9 = vld [vmem:[#allocation5 + $0x28] sm:$0xff]  ;;  %v157_v12 = vld [vmem:[#allocation7 + $0x10] sm:$0xff] }
  0x39   :  { %v155_v10 = vld [vmem:[#allocation7] sm:$0xff]  ;;  %v156_v11 = vld [vmem:[#allocation7 + $0x8] sm:$0xff]  ;;  %v158_v13 = vld [vmem:[#allocation7 + $0x18] sm:$0xff]  ;;  %v387_v14 = vpack.c.bf16 %v66_v9, %v65_v8 }
  0x3a   :  { %382 = vmatpush3.bf16.msra.mxu0 %v381_v5  ;;  %v405_v15 = vpack.c.bf16 %v156_v11, %v155_v10  ;;  %v67_v16 = vld [vmem:[#allocation5 + $0x30] sm:$0xff]  ;;  %v68_v17 = vld [vmem:[#allocation5 + $0x38] sm:$0xff]  ;;  %v408_v18 = vpack.c.bf16 %v158_v13, %v157_v12  ;;  %v159_v19 = vld [vmem:[#allocation7 + $0x20] sm:$0xff] }
  0x3b   :  { %383 = vmatprep.subr.bf16.mxu0 %v542_v0  ;;  %v160_v20 = vld [vmem:[#allocation7 + $0x28] sm:$0xff]  ;;  %v390_v21 = vpack.c.bf16 %v68_v17, %v67_v16  ;;  %v69_v22 = vld [vmem:[#allocation5 + $0x40] sm:$0xff]  ;;  %v161_v25 = vld [vmem:[#allocation7 + $0x30] sm:$0xff] }
  0x3c   :  { %406 = vmatpush3.bf16.msra.mxu1 %v405_v15  ;;  %v70_v23 = vld [vmem:[#allocation5 + $0x48] sm:$0xff]  ;;  %v411_v24 = vpack.c.bf16 %v160_v20, %v159_v19  ;;  %v162_v26 = vld [vmem:[#allocation7 + $0x38] sm:$0xff]  ;;  %v71_v28 = vld [vmem:[#allocation5 + $0x50] sm:$0xff] }
  0x3d   :  { %407 = vmatprep.subr.bf16.mxu1 %v542_v0  ;;  %v393_v27 = vpack.c.bf16 %v70_v23, %v69_v22  ;;  %v72_v29 = vld [vmem:[#allocation5 + $0x58] sm:$0xff]  ;;  %v414_v30 = vpack.c.bf16 %v162_v26, %v161_v25  ;;  %v163_v31 = vld [vmem:[#allocation7 + $0x40] sm:$0xff]  ;;  %v164_v32 = vld [vmem:[#allocation7 + $0x48] sm:$0xff] }
  0x3e   :  { %385 = vmatpush3.bf16.msra.mxu0 %v384_v7  ;;  %v396_v33 = vpack.c.bf16 %v72_v29, %v71_v28  ;;  %v73_v34 = vld [vmem:[#allocation5 + $0x60] sm:$0xff]  ;;  %v74_v35 = vld [vmem:[#allocation5 + $0x68] sm:$0xff]  ;;  %v417_v36 = vpack.c.bf16 %v164_v32, %v163_v31  ;;  %v75_v38 = vld [vmem:[#allocation5 + $0x70] sm:$0xff] }
  0x3f   :  { %386 = vmatprep.subr.bf16.mxu0 %v542_v0  ;;  %v399_v37 = vpack.c.bf16 %v74_v35, %v73_v34  ;;  %v76_v39 = vld [vmem:[#allocation5 + $0x78] sm:$0xff]  ;;  %v165_v42 = vld [vmem:[#allocation7 + $0x50] sm:$0xff]  ;;  %v167_v45 = vld [vmem:[#allocation7 + $0x60] sm:$0xff] }
  0x40   :  { %409 = vmatpush3.bf16.msra.mxu1 %v408_v18  ;;  %v402_v40 = vpack.c.bf16 %v76_v39, %v75_v38  ;;  %v60_v41 = vld [vmem:[#allocation2] sm:$0xff]  ;;  %v168_v46 = vld [vmem:[#allocation7 + $0x68] sm:$0xff]  ;;  %v169_v48 = vld [vmem:[#allocation7 + $0x70] sm:$0xff] }
  0x41   :  { %410 = vmatprep.subr.bf16.mxu1 %v542_v0  ;;  %v166_v43 = vld [vmem:[#allocation7 + $0x58] sm:$0xff]  ;;  %v423_v47 = vpack.c.bf16 %v168_v46, %v167_v45 }
  0x42   :  { %388 = vmatpush3.bf16.msra.mxu0 %v387_v14  ;;  %v420_v44 = vpack.c.bf16 %v166_v43, %v165_v42  ;;  %v170_v49 = vld [vmem:[#allocation7 + $0x78] sm:$0xff] }
  0x43   :  { %389 = vmatprep.subr.bf16.mxu0 %v542_v0  ;;  %v426_v50 = vpack.c.bf16 %v170_v49, %v169_v48  ;;  %v274_v51 = vld [vmem:[%s654_s2] ss:$0 sm:$0xff]  ;;  %s545_s2 = smov [#allocation8]  }
  0x44   :  { %412 = vmatpush3.bf16.msra.mxu1 %v411_v24  ;;  %v275_v56 = vld [vmem:[%s656_s4] ss:$0 sm:$0xff]  ;;  %s264_s7 = sshll.u32 %s545_s2, 4  ;;  %s265_s7 = int_to_ptr.vmem [resolvable:$true] %s264_s7 }
  0x45   :  { %413 = vmatprep.subr.bf16.mxu1 %v542_v0  ;;  %s509_s8 = scalar_lea.vmem %s265_s7, 128  ;;  %p514_p11 = scmp.lt.s32.totalorder %s265_s7, %s265_s7 }
  0x46   :  { %391 = vmatpush3.bf16.msra.mxu0 %v390_v21  ;;  %p510_p10 = scmp.ne.s32.totalorder %s265_s7, %s509_s8  ;;  %p515_p12 = scmp.lt.s32.totalorder %s509_s8, %s509_s8 }
  0x47   :  { %392 = vmatprep.subr.bf16.mxu0 %v542_v0 }
  0x48   :  { %415 = vmatpush3.bf16.msra.mxu1 %v414_v30  ;;  %p516_p13 = por %p515_p12, %p514_p11 }
  0x49   :  { %416 = vmatprep.subr.bf16.mxu1 %v542_v0 }
  0x4a   :  { %394 = vmatpush3.bf16.msra.mxu0 %v393_v27  ;;  %p517_p0 = pnand %p516_p13, %p510_p10 }
  0x4b   :  { %395 = vmatprep.subr.bf16.mxu0 %v542_v0 }
  0x4c   :  { %418 = vmatpush3.bf16.msra.mxu1 %v417_v36 }
  0x4d   :  { %419 = vmatprep.subr.bf16.mxu1 %v542_v0 }
  0x4e   :  { %397 = vmatpush3.bf16.msra.mxu0 %v396_v33 }
  0x4f   :  { %398 = vmatprep.subr.bf16.mxu0 %v542_v0 }
  0x50   :  { %421 = vmatpush3.bf16.msra.mxu1 %v420_v44 }
  0x51   :  { %422 = vmatprep.subr.bf16.mxu1 %v542_v0 }
  0x52   :  { %400 = vmatpush3.bf16.msra.mxu0 %v399_v37 }
  0x53   :  { %401 = vmatprep.subr.bf16.mxu0 %v542_v0 }
  0x54   :  { %424 = vmatpush3.bf16.msra.mxu1 %v423_v47 }
  0x55   :  { %425 = vmatprep.subr.bf16.mxu1 %v542_v0 }
  0x56   :  { %403 = vmatpush3.bf16.msra.mxu0 %v402_v40 }
  0x58   :  { %427 = vmatpush3.bf16.msra.mxu1 %v426_v50 }
  0x59   :  { %343 = vmatmul.mubr.f32.vlgmr.msra.gmra.mrb[0].mxu0 %v60_v41 }
 0x12c   :  { %v150_v52 = vpop.f32.mrb[0].mxu0 }
 0x12d   :  { %v151_v53 = vadd.f32 %v274_v51, %v150_v52  ;;  %v344_v54 = vpop.f32.mrb[1].mxu0 }
 0x12f   :  { %437 = vtanh.f32 %v151_v53 }
 0x139   :  { %v438_v55 = vpop.eup %437 }
 0x13a   :  { %378 = vmatmul.mubr.f32.vlgmr.msra.gmra.mrb[0].mxu1 %v438_v55 }
 0x20d   :  { %v244_v57 = vpop.f32.mrb[0].mxu1 }
 0x20e   :  { %v245_v58 = vadd.f32 %v275_v56, %v244_v57  ;;  %v379_v59 = vpop.f32.mrb[1].mxu1 }
 0x210   :  { %248 = vmax.xlane.f32.xlu0 %v245_v58 }
 0x29d   :  { %v249_v60 = vpop.xlane.xlu0 %248 }
 0x29e   :  { %v250_v61 = vsub.f32 %v245_v58, %v249_v60 }
 0x2a0   :  { %v251_v62 = vmul.f32 1.442695, %v250_v61 }
 0x2a2   :  { %439 = vpow2.f32 %v251_v62 }
 0x2ac   :  { %v440_v63 = vpop.eup %439 }
 0x2ad   :  { %253 = vadd.xlane.f32.xlu0 %v440_v63 }
 0x33a   :  { %v254_v0 = vpop.xlane.xlu0 %253 }
 0x33b   :  { %441 = vrcp.f32 %v254_v0 }
 0x345   :  { %v442_v1 = vpop.eup %441 }
 0x346   :  { %v256_v2 = vmul.f32 %v442_v1, %v440_v63 }
 0x348   :  { %257 = vst [vmem:[#allocation8] sm:$0xff] %v256_v2 }
 0x349   :  { %520 = shalt.err (!%p517_p0)
}
 0x34a   :  { %s521_s10 = scalar_lea.hbm %s657_s5, 128 }
 0x34b   :  { %p522_p1 = scmp.ne.s32.totalorder %s657_s5, %s521_s10  ;;  %p525_p2 = scmp.lt.u32.totalorder %s521_s10, %s657_s5 }
 0x34d   :  { %p527_p3 = pnand %p525_p2, %p522_p1 }
 0x34f   :  { %530 = shalt.err (!%p527_p3)
}
 0x350   :  { %267 = dma.vmem_to_hbm [thread:$0]  %s265_s7, 128, %s657_s5, [#allocation4]  }
 0x351   :  { %535 = dma.done.wait [#allocation4], 128  }
 0x352   :  { %536 = vsyncadd [#allocation4], 4294967168 }
 0x353   :  { %271 = vsyncpa [#allocation3], 1 }
 0x354   :  { %272 = vsyncpa [#allocation6], 1 }
 0x355   :  { %273 = vsyncpa [#allocation4], 1 }

</bundles_post_ra>
